<compile_context>
chip_gen: v7x
topology: tpu7x:2x2x1
jax: 0.10.0
libtpu: 0.0.40
codegen_flags: <defaults>
</compile_context>

<pallas_src>
import functools

import jax
import jax.numpy as jnp
from jax.experimental import pallas as pl
from jax.experimental.pallas import tpu as pltpu


def _round_up(v, m):
    return (v + m - 1) // m * m


def _pick_tile_b(batch, feat, c_pad):
    """Batch-tile size: VMEM-budgeted, >=2 tiles when possible (v7x megacore)."""
    if batch <= 8:
        return batch  # block == full array dim (legal even when < 8)
    # Double-buffered per-step working set: bf16 x tile + f32 logits tile
    # (weight/bias residents are tiny). Multiples of 16 for bf16 sublane packing.
    budget = 16 << 20
    per_row = 2 * (2 * feat + 4 * c_pad)
    t = max(16, min(2048, (budget // per_row) // 16 * 16))
    if batch <= t:
        # A single tile would cover the whole batch; split so the "parallel"
        # grid axis can use both TensorCores on v7x.
        t = max(16, min(t, _round_up((batch + 1) // 2, 16)))
    return t


# ----------------------------- kernels --------------------------------------
def _linear_kernel(x_ref, w_ref, b_ref, o_ref):
    # x: (TILE_B, F) bf16   w: (F, C_pad) bf16   b: (1, C_pad) f32
    # o: (TILE_B, C_pad) f32
    logits = jax.lax.dot_general(
        x_ref[...], w_ref[...],
        dimension_numbers=(((1,), (0,)), ((), ())),
        preferred_element_type=jnp.float32,
    )
    o_ref[...] = logits + b_ref[...]


def _linear_ce_kernel(x_ref, w_ref, b_ref, y_ref, part_ref,
                      *, num_classes, batch_valid, tile_b):
    i = pl.program_id(0)

    logits = jax.lax.dot_general(
        x_ref[...], w_ref[...],
        dimension_numbers=(((1,), (0,)), ((), ())),
        preferred_element_type=jnp.float32,
    ) + b_ref[...]                                            # (TILE_B, C_pad) f32
    tb, c_pad = logits.shape

    # Mask class-padding columns (>= num_classes) out of the softmax.
    class_ids = jax.lax.broadcasted_iota(jnp.int32, (tb, c_pad), 1)
    col_valid = class_ids < num_classes
    masked = jnp.where(col_valid, logits, jnp.float32(-1e30))

    # Numerically stable log-softmax, all in f32 (VPU/EUP friendly on v5e too).
    m = jnp.max(masked, axis=-1, keepdims=True)
    shifted = masked - m
    lse = jnp.log(jnp.sum(jnp.exp(shifted), axis=-1, keepdims=True))
    log_probs = shifted - lse

    # Target log-prob via iota one-hot (no gather).
    onehot = jnp.logical_and(class_ids == y_ref[...], col_valid).astype(jnp.float32)
    nll = -jnp.sum(onehot * log_probs, axis=-1, keepdims=True)  # (TILE_B, 1)

    # Mask rows beyond the real batch (partial last tile) via global row index.
    row_ids = i * tile_b + jax.lax.broadcasted_iota(jnp.int32, (tb, 1), 0)
    nll = jnp.where(row_ids < batch_valid, nll, jnp.float32(0.0))
    partial = jnp.sum(nll)

    # Per-tile partial sum into a disjoint (8, 128) VMEM block: no cross-step
    # dependency, so the batch axis stays "parallel" (both v7x TensorCores).
    r = jax.lax.broadcasted_iota(jnp.int32, part_ref.shape, 0)
    c = jax.lax.broadcasted_iota(jnp.int32, part_ref.shape, 1)
    part_ref[...] = jnp.where((r == 0) & (c == 0), partial, jnp.float32(0.0))


# ----------------------------- wrapper ---------------------------------------
def make_torch_model_forward(weight, bias):
    """Returns forward(x, y=None), closing over pre-padded / pre-cast params.

    weight: (C, F) float32  (torch nn.Linear.weight layout)
    bias:   (C,)   float32
    """
    C, F = weight.shape
    C_pad = _round_up(C, 8)

    # One-time parameter prep (hoisted out of the per-dispatch path):
    # pad classes to 8 lanes, transpose to MXU-native (K, N), bf16 for the MXU.
    w_t = jnp.pad(weight.astype(jnp.float32), ((0, C_pad - C), (0, 0))).T
    w_t = jnp.asarray(w_t, dtype=jnp.bfloat16)                      # (F, C_pad)
    b_pad = jnp.pad(bias.astype(jnp.float32), (0, C_pad - C)).reshape(1, C_pad)

    def forward(x, y=None):
        B = x.shape[0]
        x_in = x.astype(jnp.bfloat16)           # MXU operand; f32 accumulation
        tile_b = _pick_tile_b(B, F, C_pad)
        num_tiles = pl.cdiv(B, tile_b)

        if y is None:
            out = pl.pallas_call(
                _linear_kernel,
                out_shape=jax.ShapeDtypeStruct((B, C_pad), jnp.float32),
                grid=(num_tiles,),
                in_specs=[
                    pl.BlockSpec((tile_b, F), lambda i: (i, 0)),   # x (pipelined)
                    pl.BlockSpec((F, C_pad), lambda i: (0, 0)),    # weight (resident)
                    pl.BlockSpec((1, C_pad), lambda i: (0, 0)),    # bias (resident)
                ],
                out_specs=pl.BlockSpec((tile_b, C_pad), lambda i: (i, 0)),
                compiler_params=pltpu.CompilerParams(
                    dimension_semantics=("parallel",)),
                cost_estimate=pl.CostEstimate(
                    flops=2 * B * F * C_pad,
                    transcendentals=0,
                    bytes_accessed=2 * B * F + 2 * F * C_pad + 4 * C_pad
                                   + 4 * B * C_pad),
            )(x_in, w_t, b_pad)
            return out[:, :C]

        y_2d = y.reshape(-1).astype(jnp.int32).reshape(B, 1)
        kernel = functools.partial(
            _linear_ce_kernel, num_classes=C, batch_valid=B, tile_b=tile_b)

        partials = pl.pallas_call(
            kernel,
            out_shape=jax.ShapeDtypeStruct((num_tiles * 8, 128), jnp.float32),
            grid=(num_tiles,),
            in_specs=[
                pl.BlockSpec((tile_b, F), lambda i: (i, 0)),
                pl.BlockSpec((F, C_pad), lambda i: (0, 0)),
                pl.BlockSpec((1, C_pad), lambda i: (0, 0)),
                pl.BlockSpec((tile_b, 1), lambda i: (i, 0)),       # labels
            ],
            out_specs=pl.BlockSpec((8, 128), lambda i: (i, 0)),
            compiler_params=pltpu.CompilerParams(
                dimension_semantics=("parallel",)),
            cost_estimate=pl.CostEstimate(
                flops=2 * B * F * C_pad,
                transcendentals=B * (C_pad + 1),
                bytes_accessed=2 * B * F + 2 * F * C_pad + 4 * C_pad + 4 * B
                               + 4 * num_tiles * 8 * 128),
        )(x_in, w_t, b_pad, y_2d)

        # Trivial final reduce + mean over the GLOBAL batch size.
        return jnp.sum(partials) / jnp.float32(B)

    return forward


# ----------------------------- main -------------------------------------------
if __name__ == "__main__":
    INPUT_SIZE = 32
    NUM_CLASSES = 5
    BATCH = 8

    key = jax.random.PRNGKey(0)
    kx, kw, kb, ky, kx2, ky2 = jax.random.split(key, 6)

    # deterministic synthetic parameters (shapes from nn.Linear(input_size, 5))
    x = jax.random.normal(kx, (BATCH, INPUT_SIZE), dtype=jnp.float32)
    weight = jax.random.normal(kw, (NUM_CLASSES, INPUT_SIZE), dtype=jnp.float32) * 0.1
    bias = jax.random.normal(kb, (NUM_CLASSES,), dtype=jnp.float32) * 0.1
    y = jax.random.randint(ky, (BATCH,), 0, NUM_CLASSES, dtype=jnp.int32)

    fwd = jax.jit(make_torch_model_forward(weight, bias))

    # inference path
    logits = jax.block_until_ready(fwd(x))
    # training path (cross-entropy loss)
    loss = jax.block_until_ready(fwd(x, y))

    # Pure-JAX reference using the same bf16-rounded MXU operands (f32 math).
    def reference(xv, yv):
        xr = xv.astype(jnp.bfloat16).astype(jnp.float32)
        wr = weight.astype(jnp.bfloat16).astype(jnp.float32)
        lg = xr @ wr.T + bias
        lse = jax.scipy.special.logsumexp(lg, axis=-1)
        ls = jnp.mean(lse - lg[jnp.arange(xv.shape[0]), yv])
        return lg, ls

    ref_logits, ref_loss = reference(x, y)
    assert jnp.allclose(logits, ref_logits, atol=1e-3, rtol=1e-3)
    assert jnp.allclose(loss, ref_loss, atol=1e-3, rtol=1e-3)

    # second check: multi-tile grid + non-divisible batch (partial last tile)
    BATCH2 = 300
    x2 = jax.random.normal(kx2, (BATCH2, INPUT_SIZE), dtype=jnp.float32)
    y2 = jax.random.randint(ky2, (BATCH2,), 0, NUM_CLASSES, dtype=jnp.int32)

    logits2 = jax.block_until_ready(fwd(x2))
    loss2 = jax.block_until_ready(fwd(x2, y2))

    ref_logits2, ref_loss2 = reference(x2, y2)
    assert jnp.allclose(logits2, ref_logits2, atol=1e-3, rtol=1e-3)
    assert jnp.allclose(loss2, ref_loss2, atol=1e-3, rtol=1e-3)

    print("KERNEL_OK")
</pallas_src>

<mosaic_0001>
module attributes {stable_mosaic.version = 11 : i64} {
  func.func @_linear_kernel(%arg0: i32, %arg1: memref<8x32xbf16, #tpu.memory_space<vmem>>, %arg2: memref<32x8xbf16, #tpu.memory_space<vmem>>, %arg3: memref<1x8xf32, #tpu.memory_space<vmem>>, %arg4: memref<8x8xf32, #tpu.memory_space<vmem>>) attributes {dimension_semantics = [#tpu.dimension_semantics<parallel>], iteration_bounds = array<i64: 1>, scalar_prefetch = 0 : i64, scratch_operands = 0 : i64, tpu.core_type = #tpu.core_type<tc>, window_params = [{transform_indices = @transform_0, window_bounds = array<i64: 8, 32>}, {pipeline_mode = #tpu.pipeline_mode<synchronous>, transform_indices = @transform_1, window_bounds = array<i64: 32, 8>}, {pipeline_mode = #tpu.pipeline_mode<synchronous>, transform_indices = @transform_2, window_bounds = array<i64: 1, 8>}, {transform_indices = @transform_3, window_bounds = array<i64: 8, 8>}]} {
    %c0 = arith.constant 0 : index
    %c0_0 = arith.constant 0 : index
    %0 = vector.load %arg1[%c0, %c0_0] : memref<8x32xbf16, #tpu.memory_space<vmem>>, vector<8x32xbf16>
    %c0_1 = arith.constant 0 : index
    %c0_2 = arith.constant 0 : index
    %1 = vector.load %arg2[%c0_1, %c0_2] : memref<32x8xbf16, #tpu.memory_space<vmem>>, vector<32x8xbf16>
    %cst = arith.constant dense<0.000000e+00> : vector<8x8xf32>
    %2 = tpu.matmul %0, %1, %cst {dimension_numbers = #tpu.dot_dimension_numbers<[1], [0], [0], [1], [0, 0, 1, 1], [], []>} : vector<8x32xbf16>, vector<32x8xbf16>, vector<8x8xf32> -> vector<8x8xf32>
    %c0_3 = arith.constant 0 : index
    %c0_4 = arith.constant 0 : index
    %3 = vector.load %arg3[%c0_3, %c0_4] : memref<1x8xf32, #tpu.memory_space<vmem>>, vector<1x8xf32>
    %4 = vector.broadcast %3 : vector<1x8xf32> to vector<8x8xf32>
    %5 = arith.addf %2, %4 : vector<8x8xf32>
    %c0_5 = arith.constant 0 : index
    %c0_6 = arith.constant 0 : index
    %6 = vector.load %arg4[%c0_5, %c0_6] : memref<8x8xf32, #tpu.memory_space<vmem>>, vector<8x8xf32>
    tpu.vector_store %arg4[%c0_5, %c0_6], %5 {strides = array<i32>} : memref<8x8xf32, #tpu.memory_space<vmem>>, vector<8x8xf32>,
    return
  }
  func.func @transform_0(%arg0: i32) -> (i32, i32) {
    %c0_i32 = arith.constant 0 : i32
    %c0_i32_0 = arith.constant 0 : i32
    return %arg0, %c0_i32 : i32, i32
  }
  func.func @transform_1(%arg0: i32) -> (i32, i32) {
    %c0_i32 = arith.constant 0 : i32
    %c0_i32_0 = arith.constant 0 : i32
    %c0_i32_1 = arith.constant 0 : i32
    return %c0_i32, %c0_i32_0 : i32, i32
  }
  func.func @transform_2(%arg0: i32) -> (i32, i32) {
    %c0_i32 = arith.constant 0 : i32
    %c0_i32_0 = arith.constant 0 : i32
    %c0_i32_1 = arith.constant 0 : i32
    return %c0_i32, %c0_i32_0 : i32, i32
  }
  func.func @transform_3(%arg0: i32) -> (i32, i32) {
    %c0_i32 = arith.constant 0 : i32
    %c0_i32_0 = arith.constant 0 : i32
    return %arg0, %c0_i32 : i32, i32
  }
}

</mosaic_0001>

<bundles_post_ra>
// kernel: forward.1
= control target key start
LH: loop header
LB: loop body
LE: loop exit
PB: predicated region body
PF: predicated region fallthrough
CT: control target
= control target key end

     0   :  { %v144_v1 = vmov 0.0   ;;  %vm145_vm0 = vmmov 0   ;;  %s191_s0 = inlined_call_operand.vmem [shape: bf16[8,32], index: 0, kind: input, shape index: {}]   ;;  %s192_s1 = inlined_call_operand.vmem [shape: bf16[32,8], index: 1, kind: input, shape index: {}]   ;;  %s193_s2 = inlined_call_operand.vmem [shape: f32[1,8], index: 2, kind: input, shape index: {}]   ;;  %s194_s3 = inlined_call_operand.hbm [shape: f32[8,8], index: 3, kind: output, shape index: {}]  }
   0x1   :  { %v118_v0 = vld [vmem:[%s192_s1] sm:$0xff]   ;;  %107 = vmatprep.subr.bf16.mxu0 %v144_v1  ;;  %v119_v2 = vld [vmem:[%s192_s1 + $0x8] sm:$0xff]   ;;  %111 = vmatprep.mubr.msk.bf16.mxu0 %vm145_vm0, %v144_v1 }
   0x2   :  { %108 = vmatpush3.bf16.msra.mxu0 %v118_v0 }
   0x3   :  { %109 = vmatprep.subr.bf16.mxu0 %v144_v1 }
   0x4   :  { %8 = vsyncpa [#allocation3], 0  ;;  %v16_v3 = vld [vmem:[%s191_s0] sm:$0xf]  ;;  %vm40_vm1 = vcmask 261120   ;;  %s146_s20 = smov [#allocation2]  }
   0x5   :  { %v100_v4 = vld [vmem:[%s193_s2] ss:$0 sm:$0xff]  ;;  %s92_s21 = sshll.u32 %s146_s20, 4  ;;  %vm84_vm2 = vcmask 64512   ;;  %s93_s21 = int_to_ptr.vmem [resolvable:$true] %s92_s21 }
   0x6   :  { %110 = vmatpush3.bf16.msra.mxu0 %v119_v2  ;;  %s120_s1 = scalar_lea.vmem %s93_s21, 128  ;;  %p125_p1 = scmp.lt.s32.totalorder %s93_s21, %s93_s21 }
   0x7   :  { %p121_p0 = scmp.ne.s32.totalorder %s93_s21, %s120_s1  ;;  %p126_p2 = scmp.lt.s32.totalorder %s120_s1, %s120_s1 }
   0x9   :  { %112 = vmatmul.mubr.msk.bf16.vlgmr.msra.gmra.mrb[0].mxu0 %vm40_vm1, %v16_v3  ;;  %p127_p3 = por %p126_p2, %p125_p1 }
   0xb   :  { %p128_p4 = pnand %p127_p3, %p121_p0 }
  0xdc   :  { %v78_v5 = vpop.f32.mrb[0].mxu0 }
  0xdd   :  { %v79_v6 = vadd.f32 %v100_v4, %v78_v5  ;;  %v113_v7 = vpop.f32.mrb[1].mxu0 }
  0xde   :  { %v81_v8 = vpop.f32.mrb[2].mxu0 }
  0xdf   :  { %v114_v9 = vpop.f32.mrb[3].mxu0  ;;  %85 = vst.msk [vmem:[#allocation2] sm:$0xff] %vm84_vm2, %v79_v6 }
  0xe0   :  { %131 = shalt.err (!%p128_p4)
}
  0xe1   :  { %s132_s2 = scalar_lea.hbm %s194_s3, 128 }
  0xe2   :  { %p133_p5 = scmp.ne.s32.totalorder %s194_s3, %s132_s2  ;;  %p136_p6 = scmp.lt.u32.totalorder %s132_s2, %s194_s3 }
  0xe4   :  { %p138_p7 = pnand %p136_p6, %p133_p5 }
  0xe6   :  { %141 = shalt.err (!%p138_p7)
}
  0xe7   :  { %95 = dma.vmem_to_hbm [thread:$0]  %s93_s21, 128, %s194_s3, [#allocation3]  }
  0xe8   :  { %142 = dma.done.wait [#allocation3], 128  }
  0xe9   :  { %143 = vsyncadd [#allocation3], 4294967168 }
  0xea   :  { %99 = vsyncpa [#allocation3], 1 }

</bundles_post_ra>
